<compile_context>
chip_gen: v6e
topology: v6e:2x2x1
jax: 0.10.0
libtpu: 0.0.40
codegen_flags: <defaults>
</compile_context>

<pallas_src>
import functools

import jax
import jax.numpy as jnp
import numpy as np
from jax import lax
from jax.experimental import pallas as pl
from jax.experimental.pallas import tpu as pltpu

ALPHA = 0.5
GAMMA = 2
IGNORE_INDEX = 255
_MAX_UNROLL_CLASSES = 16


def _focal_partial_kernel(logits_ref, labels_ref, sum_ref, cnt_ref,
                          acc_sum, acc_cnt, *, num_classes, rows_total,
                          tile_rows, ignore_index, unrolled):
    t = pl.program_id(1)

    @pl.when(t == 0)
    def _():
        acc_sum[...] = jnp.zeros_like(acc_sum)
        acc_cnt[...] = jnp.zeros_like(acc_cnt)

    # Labels travel in their narrow storage dtype; widen once per block here.
    labels = labels_ref[0].astype(jnp.int32)            # (TR, L)
    shape = labels.shape
    has_tail = rows_total % tile_rows != 0               # trace-time constant

    def load_native(c):
        return logits_ref[0, c]                           # (TR, L), storage dtype

    def load_f32(c):
        return logits_ref[0, c].astype(jnp.float32)

    if unrolled:
        # Running max over classes in the native dtype (bf16 stays bf16).
        m = load_native(0)
        for c in range(1, num_classes):
            m = jnp.maximum(m, load_native(c))
        m = m.astype(jnp.float32)
        # sum_c exp(x_c - m) and the logit selected by the label (compare, no gather).
        s = jnp.zeros(shape, jnp.float32)
        picked = jnp.zeros(shape, jnp.float32)
        for c in range(num_classes):
            x = load_f32(c)
            s = s + jnp.exp(x - m)
            picked = picked + jnp.where(labels == c, x, 0.0)
    else:
        # Large class counts: partially-unrolled fori_loop (no huge unroll / spills).
        m = lax.fori_loop(1, num_classes,
                          lambda c, mm: jnp.maximum(mm, load_native(c)),
                          load_native(0), unroll=4).astype(jnp.float32)

        def body(c, carry):
            s, picked = carry
            x = load_f32(c)
            return (s + jnp.exp(x - m),
                    picked + jnp.where(labels == c, x, 0.0))

        s, picked = lax.fori_loop(
            0, num_classes, body,
            (jnp.zeros(shape, jnp.float32), jnp.zeros(shape, jnp.float32)),
            unroll=4)

    valid = labels != ignore_index
    if has_tail:
        row_ids = lax.broadcasted_iota(jnp.int32, shape, 0) + t * tile_rows
        valid = jnp.logical_and(valid, row_ids < rows_total)
    validf = valid.astype(jnp.float32)

    # Per-pixel -log softmax(label) = logsumexp - picked_logit.  Mask once with
    # a select (garbage tail / ignored pixels never reach the accumulator).
    nll = m + jnp.log(s) - picked
    acc_sum[...] += jnp.where(valid, nll, 0.0)
    # Counts: per-step sublane reduce on the otherwise-idle XLU into a tiny slab.
    acc_cnt[...] += jnp.sum(validf, axis=0, keepdims=True)

    @pl.when(t == pl.num_programs(1) - 1)
    def _():
        sum_ref[...] = jnp.sum(acc_sum[...]).reshape(1, 1, 1)
        cnt_ref[...] = jnp.sum(acc_cnt[...]).reshape(1, 1, 1)


def _vmem_capacity_bytes():
    try:
        cap = getattr(pltpu.get_tpu_info(), "vmem_capacity_bytes", None)
        if cap:
            return int(cap)
    except Exception:
        pass
    return 128 * 1024 * 1024


def _dim_semantics(num_batches):
    # v7x has two TensorCores behind one device; plain "parallel" does not
    # split the grid across them -- CORE_PARALLEL does.
    try:
        kind = jax.devices()[0].device_kind.lower()
    except Exception:
        kind = ""
    if ("v7" in kind and num_batches >= 2
            and hasattr(pltpu, "CORE_PARALLEL") and hasattr(pltpu, "ARBITRARY")):
        return (pltpu.CORE_PARALLEL, pltpu.ARBITRARY)
    # TODO(synk): on v7x with N == 1 (or odd N), split the row-tile axis across
    # the two cores with per-core partial (sum, count) outputs instead.
    return ("parallel", "arbitrary")


def _sublane_align(dtype):
    # (8,128) tiling for 32-bit, (16,128) for 16-bit, (32,128) for 8-bit.
    return max(8, 32 // jnp.dtype(dtype).itemsize)


def _pick_tile_rows(rows, c, lanes, logit_itemsize, block_bytes, align):
    budget = block_bytes // max(1, c * lanes * logit_itemsize)
    budget = max(align, (budget // align) * align)
    if budget >= rows:
        return rows                       # single full-height block (always legal)
    # Prefer an aligned tile that evenly divides rows (tail path elided at
    # trace time); accept up to 2x more grid steps for that.
    for tr in range(budget, max(align, budget // 2) - 1, -align):
        if rows % tr == 0:
            return tr
    return budget                         # no good divisor: byte budget + tail mask


@functools.partial(jax.jit, static_argnames=("tile_rows", "block_bytes"))
def focal_loss_mul(preds_nchw, labels_nhw, tile_rows=None, block_bytes=None):
    """preds_nchw: (N, C, H, W) float logits; labels_nhw: (N, H, W) int labels."""
    n, c, h, w = preds_nchw.shape
    p = h * w

    # Free contiguous reshapes only -- no transpose / pad / astype of logits.
    if p % 128 == 0:
        lanes, rows = 128, p // 128        # fully lane-dense pixel slabs
    else:
        # TODO(synk): H*W not a multiple of 128 with W < 128 is lane-sparse; a
        # flat-pixel tiling would need an in-kernel relayout, so keep (H, W).
        lanes, rows = w, h
    logits = preds_nchw.reshape(n, c, rows, lanes)

    # Keep labels in their native narrow dtype (uint8/int8/int16/int32); only
    # 64-bit types are narrowed.  Widening to int32 happens inside the kernel.
    if jnp.dtype(labels_nhw.dtype).itemsize > 4:
        labels_nhw = labels_nhw.astype(jnp.int32)
    labels = labels_nhw.reshape(n, rows, lanes)

    logit_isz = jnp.dtype(preds_nchw.dtype).itemsize
    label_isz = jnp.dtype(labels.dtype).itemsize

    vmem_cap = _vmem_capacity_bytes()
    if block_bytes is None:
        # ~8 MiB blocks on 128 MiB-VMEM parts (v5e/v6e), ~6.4 MiB on v7x (64 MiB).
        block_bytes = min(8 << 20, max(2 << 20, vmem_cap // 10))

    align = max(_sublane_align(preds_nchw.dtype), _sublane_align(labels.dtype))
    if tile_rows is None:
        tr = _pick_tile_rows(rows, c, lanes, logit_isz, block_bytes, align)
    else:
        tr = tile_rows
    tr = min(tr, rows)
    num_tiles = pl.cdiv(rows, tr)
    grid = (n, num_tiles)

    kernel = functools.partial(
        _focal_partial_kernel,
        num_classes=c, rows_total=rows, tile_rows=tr,
        ignore_index=IGNORE_INDEX, unrolled=(c <= _MAX_UNROLL_CLASSES))

    # VMEM budget (already includes the x2 double-buffering; no extra factor):
    need = (2 * c * tr * lanes * logit_isz     # logits block, double-buffered
            + 2 * tr * lanes * label_isz       # labels block, double-buffered
            + tr * lanes * 4                   # acc_sum scratch slab
            + lanes * 4)                       # acc_cnt scratch (tiny)
    vmem_limit = max(16 << 20, need + (6 << 20))
    vmem_limit = int(min(vmem_limit, max(int(0.45 * vmem_cap), need + (2 << 20))))

    part_sum, part_cnt = pl.pallas_call(
        kernel,
        out_shape=(jax.ShapeDtypeStruct((n, 1, 1), jnp.float32),
                   jax.ShapeDtypeStruct((n, 1, 1), jnp.float32)),
        grid_spec=pltpu.PrefetchScalarGridSpec(
            num_scalar_prefetch=0,
            grid=grid,
            in_specs=[
                pl.BlockSpec((1, c, tr, lanes), lambda i, t: (i, 0, t, 0)),
                pl.BlockSpec((1, tr, lanes), lambda i, t: (i, t, 0)),
            ],
            out_specs=[
                pl.BlockSpec((1, 1, 1), lambda i, t: (i, 0, 0)),
                pl.BlockSpec((1, 1, 1), lambda i, t: (i, 0, 0)),
            ],
            scratch_shapes=[
                pltpu.VMEM((tr, lanes), jnp.float32),   # running per-pixel nll sums
                pltpu.VMEM((1, lanes), jnp.float32),    # running valid-pixel counts
            ],
        ),
        compiler_params=pltpu.CompilerParams(
            dimension_semantics=_dim_semantics(n),
            vmem_limit_bytes=vmem_limit),
    )(logits, labels)

    # Tiny scalar epilogue: mean CE over non-ignored pixels + focal transform.
    # (Matches nn.CrossEntropyLoss(reduction='mean', ignore_index) semantics.)
    # TODO(synk): class `weight` tensor of CrossEntropyLoss not implemented (module default is None).
    ce = jnp.sum(part_sum) / jnp.sum(part_cnt)
    logpt = -ce
    pt = jnp.exp(logpt)
    return -((1.0 - pt) ** GAMMA) * ALPHA * logpt


def _reference_focal(preds_nchw, labels_nhw):
    n, c, h, w = preds_nchw.shape
    logits = jnp.transpose(preds_nchw, (0, 2, 3, 1)).reshape(-1, c).astype(jnp.float32)
    labels = labels_nhw.reshape(-1).astype(jnp.int32)
    valid = labels != IGNORE_INDEX
    safe = jnp.where(valid, labels, 0)
    logp = jax.nn.log_softmax(logits, axis=-1)
    nll = -jnp.take_along_axis(logp, safe[:, None], axis=-1)[:, 0]
    ce = jnp.sum(jnp.where(valid, nll, 0.0)) / jnp.sum(valid.astype(jnp.float32))
    logpt = -ce
    pt = jnp.exp(logpt)
    return -((1.0 - pt) ** GAMMA) * ALPHA * logpt


def _run_check(key, n, c, h, w, label_dtype, **kwargs):
    k_pred, k_lab, k_ign = jax.random.split(key, 3)
    preds = jax.random.normal(k_pred, (n, c, h, w), dtype=jnp.float32)
    labels = jax.random.randint(k_lab, (n, h, w), 0, c, dtype=jnp.int32)
    ignore_mask = jax.random.bernoulli(k_ign, 0.1, (n, h, w))
    labels = jnp.where(ignore_mask, IGNORE_INDEX, labels).astype(label_dtype)

    loss = focal_loss_mul(preds, labels, **kwargs)
    jax.block_until_ready(loss)
    ref = _reference_focal(preds, labels)
    np.testing.assert_allclose(np.asarray(loss), np.asarray(ref),
                               rtol=1e-5, atol=1e-5)


if __name__ == "__main__":
    root = jax.random.PRNGKey(0)

    # 1) Canonical small shape, uint8 labels (native narrow-dtype path).
    _run_check(jax.random.fold_in(root, 1), 2, 4, 16, 16, jnp.uint8)
    # 2) Multi-tile accumulation with an evenly-dividing tile (tail elided).
    _run_check(jax.random.fold_in(root, 2), 2, 4, 64, 128, jnp.uint8,
               block_bytes=64 * 1024)
    # 3) Row tail (rows % tile_rows != 0) exercising the in-kernel select mask.
    _run_check(jax.random.fold_in(root, 3), 2, 4, 80, 64, jnp.uint8,
               block_bytes=64 * 1024)
    # 4) H*W not a multiple of 128 (fallback layout) with int32 labels.
    _run_check(jax.random.fold_in(root, 4), 2, 4, 12, 12, jnp.int32)

    print("KERNEL_OK")
</pallas_src>

<mosaic_0001>
module attributes {stable_mosaic.version = 11 : i64} {
  func.func @_focal_partial_kernel(%arg0: i32, %arg1: i32, %arg2: memref<1x4x2x128xf32, #tpu.memory_space<vmem>>, %arg3: memref<1x2x128xi8, #tpu.memory_space<vmem>>, %arg4: memref<1x1x1xf32, #tpu.memory_space<vmem>>, %arg5: memref<1x1x1xf32, #tpu.memory_space<vmem>>, %arg6: memref<2x128xf32, #tpu.memory_space<vmem>>, %arg7: memref<1x128xf32, #tpu.memory_space<vmem>>) attributes {dimension_semantics = [#tpu.dimension_semantics<parallel>, #tpu.dimension_semantics<arbitrary>], iteration_bounds = array<i64: 2, 1>, scalar_prefetch = 0 : i64, scratch_operands = 2 : i64, tpu.core_type = #tpu.core_type<tc>, window_params = [{transform_indices = @transform_0, window_bounds = array<i64: 1, 4, 2, 128>}, {transform_indices = @transform_1, window_bounds = array<i64: 1, 2, 128>}, {transform_indices = @transform_2, window_bounds = array<i64: 1, 1, 1>}, {transform_indices = @transform_3, window_bounds = array<i64: 1, 1, 1>}]} {
    %c0_i32 = arith.constant 0 : i32
    %0 = arith.cmpi eq, %arg1, %c0_i32 : i32
    %1 = arith.extui %0 : i1 to i32
    %c0_i32_0 = arith.constant 0 : i32
    %2 = arith.cmpi ne, %1, %c0_i32_0 : i32
    scf.if %2 {
      %cst_50 = arith.constant 0.000000e+00 : f32
      %79 = vector.broadcast %cst_50 : f32 to vector<2x128xf32>
      %c0_51 = arith.constant 0 : index
      %c0_52 = arith.constant 0 : index
      %80 = vector.load %arg6[%c0_51, %c0_52] : memref<2x128xf32, #tpu.memory_space<vmem>>, vector<2x128xf32>
      tpu.vector_store %arg6[%c0_51, %c0_52], %79 {strides = array<i32>} : memref<2x128xf32, #tpu.memory_space<vmem>>, vector<2x128xf32>,
      %cst_53 = arith.constant 0.000000e+00 : f32
      %81 = vector.broadcast %cst_53 : f32 to vector<1x128xf32>
      %c0_54 = arith.constant 0 : index
      %c0_55 = arith.constant 0 : index
      %82 = vector.load %arg7[%c0_54, %c0_55] : memref<1x128xf32, #tpu.memory_space<vmem>>, vector<1x128xf32>
      tpu.vector_store %arg7[%c0_54, %c0_55], %81 {strides = array<i32>} : memref<1x128xf32, #tpu.memory_space<vmem>>, vector<1x128xf32>,
    } else {
    }
    %c0 = arith.constant 0 : index
    %c0_1 = arith.constant 0 : index
    %c0_2 = arith.constant 0 : index
    %3 = vector.load %arg3[%c0, %c0_1, %c0_2] : memref<1x2x128xi8, #tpu.memory_space<vmem>>, vector<1x2x128xi8>
    %4 = vector.shape_cast %3 : vector<1x2x128xi8> to vector<2x128xi8>
    %5 = arith.extui %4 : vector<2x128xi8> to vector<2x128xi32>
    %c0_3 = arith.constant 0 : index
    %c0_4 = arith.constant 0 : index
    %c0_5 = arith.constant 0 : index
    %c0_6 = arith.constant 0 : index
    %6 = vector.load %arg2[%c0_3, %c0_4, %c0_5, %c0_6] : memref<1x4x2x128xf32, #tpu.memory_space<vmem>>, vector<1x1x2x128xf32>
    %7 = vector.shape_cast %6 : vector<1x1x2x128xf32> to vector<2x128xf32>
    %c0_7 = arith.constant 0 : index
    %c1 = arith.constant 1 : index
    %c0_8 = arith.constant 0 : index
    %c0_9 = arith.constant 0 : index
    %8 = vector.load %arg2[%c0_7, %c1, %c0_8, %c0_9] : memref<1x4x2x128xf32, #tpu.memory_space<vmem>>, vector<1x1x2x128xf32>
    %9 = vector.shape_cast %8 : vector<1x1x2x128xf32> to vector<2x128xf32>
    %10 = arith.maximumf %7, %9 : vector<2x128xf32>
    %c0_10 = arith.constant 0 : index
    %c2 = arith.constant 2 : index
    %c0_11 = arith.constant 0 : index
    %c0_12 = arith.constant 0 : index
    %11 = vector.load %arg2[%c0_10, %c2, %c0_11, %c0_12] : memref<1x4x2x128xf32, #tpu.memory_space<vmem>>, vector<1x1x2x128xf32>
    %12 = vector.shape_cast %11 : vector<1x1x2x128xf32> to vector<2x128xf32>
    %13 = arith.maximumf %10, %12 : vector<2x128xf32>
    %c0_13 = arith.constant 0 : index
    %c3 = arith.constant 3 : index
    %c0_14 = arith.constant 0 : index
    %c0_15 = arith.constant 0 : index
    %14 = vector.load %arg2[%c0_13, %c3, %c0_14, %c0_15] : memref<1x4x2x128xf32, #tpu.memory_space<vmem>>, vector<1x1x2x128xf32>
    %15 = vector.shape_cast %14 : vector<1x1x2x128xf32> to vector<2x128xf32>
    %16 = arith.maximumf %13, %15 : vector<2x128xf32>
    %cst = arith.constant 0.000000e+00 : f32
    %17 = vector.broadcast %cst : f32 to vector<2x128xf32>
    %cst_16 = arith.constant 0.000000e+00 : f32
    %18 = vector.broadcast %cst_16 : f32 to vector<2x128xf32>
    %c0_17 = arith.constant 0 : index
    %c0_18 = arith.constant 0 : index
    %c0_19 = arith.constant 0 : index
    %c0_20 = arith.constant 0 : index
    %19 = vector.load %arg2[%c0_17, %c0_18, %c0_19, %c0_20] : memref<1x4x2x128xf32, #tpu.memory_space<vmem>>, vector<1x1x2x128xf32>
    %20 = vector.shape_cast %19 : vector<1x1x2x128xf32> to vector<2x128xf32>
    %21 = arith.subf %20, %16 : vector<2x128xf32>
    %22 = math.exp %21 : vector<2x128xf32>
    %23 = arith.addf %17, %22 : vector<2x128xf32>
    %c0_i32_21 = arith.constant 0 : i32
    %24 = vector.broadcast %c0_i32_21 : i32 to vector<2x128xi32>
    %25 = arith.cmpi eq, %5, %24 : vector<2x128xi32>
    %cst_22 = arith.constant 0.000000e+00 : f32
    %26 = vector.broadcast %cst_22 : f32 to vector<2x128xf32>
    %27 = arith.select %25, %20, %26 : vector<2x128xi1>, vector<2x128xf32>
    %28 = arith.addf %18, %27 : vector<2x128xf32>
    %c0_23 = arith.constant 0 : index
    %c1_24 = arith.constant 1 : index
    %c0_25 = arith.constant 0 : index
    %c0_26 = arith.constant 0 : index
    %29 = vector.load %arg2[%c0_23, %c1_24, %c0_25, %c0_26] : memref<1x4x2x128xf32, #tpu.memory_space<vmem>>, vector<1x1x2x128xf32>
    %30 = vector.shape_cast %29 : vector<1x1x2x128xf32> to vector<2x128xf32>
    %31 = arith.subf %30, %16 : vector<2x128xf32>
    %32 = math.exp %31 : vector<2x128xf32>
    %33 = arith.addf %23, %32 : vector<2x128xf32>
    %c1_i32 = arith.constant 1 : i32
    %34 = vector.broadcast %c1_i32 : i32 to vector<2x128xi32>
    %35 = arith.cmpi eq, %5, %34 : vector<2x128xi32>
    %cst_27 = arith.constant 0.000000e+00 : f32
    %36 = vector.broadcast %cst_27 : f32 to vector<2x128xf32>
    %37 = arith.select %35, %30, %36 : vector<2x128xi1>, vector<2x128xf32>
    %38 = arith.addf %28, %37 : vector<2x128xf32>
    %c0_28 = arith.constant 0 : index
    %c2_29 = arith.constant 2 : index
    %c0_30 = arith.constant 0 : index
    %c0_31 = arith.constant 0 : index
    %39 = vector.load %arg2[%c0_28, %c2_29, %c0_30, %c0_31] : memref<1x4x2x128xf32, #tpu.memory_space<vmem>>, vector<1x1x2x128xf32>
    %40 = vector.shape_cast %39 : vector<1x1x2x128xf32> to vector<2x128xf32>
    %41 = arith.subf %40, %16 : vector<2x128xf32>
    %42 = math.exp %41 : vector<2x128xf32>
    %43 = arith.addf %33, %42 : vector<2x128xf32>
    %c2_i32 = arith.constant 2 : i32
    %44 = vector.broadcast %c2_i32 : i32 to vector<2x128xi32>
    %45 = arith.cmpi eq, %5, %44 : vector<2x128xi32>
    %cst_32 = arith.constant 0.000000e+00 : f32
    %46 = vector.broadcast %cst_32 : f32 to vector<2x128xf32>
    %47 = arith.select %45, %40, %46 : vector<2x128xi1>, vector<2x128xf32>
    %48 = arith.addf %38, %47 : vector<2x128xf32>
    %c0_33 = arith.constant 0 : index
    %c3_34 = arith.constant 3 : index
    %c0_35 = arith.constant 0 : index
    %c0_36 = arith.constant 0 : index
    %49 = vector.load %arg2[%c0_33, %c3_34, %c0_35, %c0_36] : memref<1x4x2x128xf32, #tpu.memory_space<vmem>>, vector<1x1x2x128xf32>
    %50 = vector.shape_cast %49 : vector<1x1x2x128xf32> to vector<2x128xf32>
    %51 = arith.subf %50, %16 : vector<2x128xf32>
    %52 = math.exp %51 : vector<2x128xf32>
    %53 = arith.addf %43, %52 : vector<2x128xf32>
    %c3_i32 = arith.constant 3 : i32
    %54 = vector.broadcast %c3_i32 : i32 to vector<2x128xi32>
    %55 = arith.cmpi eq, %5, %54 : vector<2x128xi32>
    %cst_37 = arith.constant 0.000000e+00 : f32
    %56 = vector.broadcast %cst_37 : f32 to vector<2x128xf32>
    %57 = arith.select %55, %50, %56 : vector<2x128xi1>, vector<2x128xf32>
    %58 = arith.addf %48, %57 : vector<2x128xf32>
    %c255_i32 = arith.constant 255 : i32
    %59 = vector.broadcast %c255_i32 : i32 to vector<2x128xi32>
    %60 = arith.cmpi ne, %5, %59 : vector<2x128xi32>
    %61 = arith.extui %60 : vector<2x128xi1> to vector<2x128xi32>
    %62 = arith.sitofp %61 : vector<2x128xi32> to vector<2x128xf32>
    %63 = math.log %53 : vector<2x128xf32>
    %64 = arith.addf %16, %63 : vector<2x128xf32>
    %65 = arith.subf %64, %58 : vector<2x128xf32>
    %c0_38 = arith.constant 0 : index
    %c0_39 = arith.constant 0 : index
    %66 = vector.load %arg6[%c0_38, %c0_39] : memref<2x128xf32, #tpu.memory_space<vmem>>, vector<2x128xf32>
    %cst_40 = arith.constant 0.000000e+00 : f32
    %67 = vector.broadcast %cst_40 : f32 to vector<2x128xf32>
    %68 = arith.select %60, %65, %67 : vector<2x128xi1>, vector<2x128xf32>
    %69 = arith.addf %66, %68 : vector<2x128xf32>
    %c0_41 = arith.constant 0 : index
    %c0_42 = arith.constant 0 : index
    %70 = vector.load %arg6[%c0_41, %c0_42] : memref<2x128xf32, #tpu.memory_space<vmem>>, vector<2x128xf32>
    tpu.vector_store %arg6[%c0_41, %c0_42], %69 {strides = array<i32>} : memref<2x128xf32, #tpu.memory_space<vmem>>, vector<2x128xf32>,
    %c0_43 = arith.constant 0 : index
    %c0_44 = arith.constant 0 : index
    %71 = vector.load %arg7[%c0_43, %c0_44] : memref<1x128xf32, #tpu.memory_space<vmem>>, vector<1x128xf32>
    %cst_45 = arith.constant dense<0.000000e+00> : vector<128xf32>
    %72 = vector.multi_reduction <add>, %62, %cst_45 [0] : vector<2x128xf32> to vector<128xf32>
    %73 = vector.shape_cast %72 : vector<128xf32> to vector<1x128xf32>
    %74 = arith.addf %71, %73 : vector<1x128xf32>
    %c0_46 = arith.constant 0 : index
    %c0_47 = arith.constant 0 : index
    %75 = vector.load %arg7[%c0_46, %c0_47] : memref<1x128xf32, #tpu.memory_space<vmem>>, vector<1x128xf32>
    tpu.vector_store %arg7[%c0_46, %c0_47], %74 {strides = array<i32>} : memref<1x128xf32, #tpu.memory_space<vmem>>, vector<1x128xf32>,
    %c0_i32_48 = arith.constant 0 : i32
    %76 = arith.cmpi eq, %arg1, %c0_i32_48 : i32
    %77 = arith.extui %76 : i1 to i32
    %c0_i32_49 = arith.constant 0 : i32
    %78 = arith.cmpi ne, %77, %c0_i32_49 : i32
    scf.if %78 {
      %c0_50 = arith.constant 0 : index
      %c0_51 = arith.constant 0 : index
      %79 = vector.load %arg6[%c0_50, %c0_51] : memref<2x128xf32, #tpu.memory_space<vmem>>, vector<2x128xf32>
      %80 = vector.shape_cast %79 : vector<2x128xf32> to vector<1x2x128xf32>
      %cst_52 = arith.constant dense<0.000000e+00> : vector<1xf32>
      %81 = vector.multi_reduction <add>, %80, %cst_52 [1, 2] : vector<1x2x128xf32> to vector<1xf32>
      %82 = vector.shape_cast %81 : vector<1xf32> to vector<1x1x1xf32>
      %83 = vector.extract %82[0, 0, 0] : f32 from vector<1x1x1xf32>
      %84 = vector.broadcast %83 : f32 to vector<1x1x1xf32>
      %c0_53 = arith.constant 0 : index
      %c0_54 = arith.constant 0 : index
      %c0_55 = arith.constant 0 : index
      %85 = vector.load %arg4[%c0_53, %c0_54, %c0_55] : memref<1x1x1xf32, #tpu.memory_space<vmem>>, vector<1x1x1xf32>
      tpu.vector_store %arg4[%c0_53, %c0_54, %c0_55], %84 {strides = array<i32>} : memref<1x1x1xf32, #tpu.memory_space<vmem>>, vector<1x1x1xf32>,
      %c0_56 = arith.constant 0 : index
      %c0_57 = arith.constant 0 : index
      %86 = vector.load %arg7[%c0_56, %c0_57] : memref<1x128xf32, #tpu.memory_space<vmem>>, vector<1x128xf32>
      %87 = vector.shape_cast %86 : vector<1x128xf32> to vector<1x1x128xf32>
      %cst_58 = arith.constant dense<0.000000e+00> : vector<1xf32>
      %88 = vector.multi_reduction <add>, %87, %cst_58 [1, 2] : vector<1x1x128xf32> to vector<1xf32>
      %89 = vector.shape_cast %88 : vector<1xf32> to vector<1x1x1xf32>
      %90 = vector.extract %89[0, 0, 0] : f32 from vector<1x1x1xf32>
      %91 = vector.broadcast %90 : f32 to vector<1x1x1xf32>
      %c0_59 = arith.constant 0 : index
      %c0_60 = arith.constant 0 : index
      %c0_61 = arith.constant 0 : index
      %92 = vector.load %arg5[%c0_59, %c0_60, %c0_61] : memref<1x1x1xf32, #tpu.memory_space<vmem>>, vector<1x1x1xf32>
      tpu.vector_store %arg5[%c0_59, %c0_60, %c0_61], %91 {strides = array<i32>} : memref<1x1x1xf32, #tpu.memory_space<vmem>>, vector<1x1x1xf32>,
    } else {
    }
    return
  }
  func.func @transform_0(%arg0: i32, %arg1: i32) -> (i32, i32, i32, i32) {
    %c0_i32 = arith.constant 0 : i32
    %c0_i32_0 = arith.constant 0 : i32
    %c0_i32_1 = arith.constant 0 : i32
    return %arg0, %c0_i32, %arg1, %c0_i32_0 : i32, i32, i32, i32
  }
  func.func @transform_1(%arg0: i32, %arg1: i32) -> (i32, i32, i32) {
    %c0_i32 = arith.constant 0 : i32
    %c0_i32_0 = arith.constant 0 : i32
    return %arg0, %arg1, %c0_i32 : i32, i32, i32
  }
  func.func @transform_2(%arg0: i32, %arg1: i32) -> (i32, i32, i32) {
    %c0_i32 = arith.constant 0 : i32
    %c0_i32_0 = arith.constant 0 : i32
    %c0_i32_1 = arith.constant 0 : i32
    return %arg0, %c0_i32, %c0_i32_0 : i32, i32, i32
  }
  func.func @transform_3(%arg0: i32, %arg1: i32) -> (i32, i32, i32) {
    %c0_i32 = arith.constant 0 : i32
    %c0_i32_0 = arith.constant 0 : i32
    %c0_i32_1 = arith.constant 0 : i32
    return %arg0, %c0_i32, %c0_i32_0 : i32, i32, i32
  }
}

</mosaic_0001>

<bundles_post_ra>
// kernel: focal_loss_mul.1
= control target key start
LH: loop header
LB: loop body
LE: loop exit
PB: predicated region body
PF: predicated region fallthrough
CT: control target
= control target key end

     0   :  { %s520_s12 = smov 0   ;;  %s522_s13 = smov 0   ;;  %s569_s0 = inlined_call_operand.vmem [shape: f32[2,4,2,128], index: 0, kind: input, shape index: {}]   ;;  %s570_s1 = inlined_call_operand.vmem [shape: u8[2,2,128], index: 1, kind: input, shape index: {}]   ;;  %s571_s2 = inlined_call_operand.vmem [shape: f32[2,1,1], index: 2, kind: output, shape index: {0}]   ;;  %s572_s3 = inlined_call_operand.vmem [shape: f32[2,1,1], index: 3, kind: output, shape index: {1}]  }
   0x1   :  { %s524_s14 = smov 0  }
   0x2 LB: > { %s26_s15 = sadd.s32 1, %s493_s13  ;;  %p426_p0 = scmp.ge.s32.totalorder %s497_s14, 1  ;;  %s497_s14 = sphi %s524_s14, %s14_s14   ;;  %s493_s13 = sphi %s522_s13, %s574_s13   ;;  %s489_s12 = sphi %s520_s12, %s573_s12  }
   0x3   : > { %p28_p1 = scmp.ge.s32.totalorder %s26_s15, 2  ;;  %p170_p2 = scmp.lt.s32.totalorder %s497_s14, 3 }
   0x5   : > { %s576_s15 = smov (%p28_p1, %s26_s15), 0  ;;  %p171_p3 = pnand %p426_p0, %p170_p2 }
   0x6   : > { %p204_p4 = scmp.lt.s32.totalorder (!%p171_p3), %s489_s12, 1 }
   0x7   : > { %174 = sbr.rel (%p171_p3) target bundleno = 285 (0x11d), region = 28 }
   0xc   : > { %v499_v0 = vmov 0.0   ;;  %s578_s12 = smov (!%p204_p4, %s489_s12), 1  ;;  %vm283_vm1 = vcmask 1041408   ;;  %vm311_vm6 = vcmask 1040384   ;;  %vm308_vm7 = vcmask 0  }
   0xd   : > { %228 = vst [vmem:[#allocation2] sm:$0x3] %v499_v0  ;;  %229 = vst [vmem:[#allocation3] sm:$0x1] %v499_v0  ;;  %s435_s16 = sshll.u32 %s578_s12, 3  ;;  %s217_s19 = scalar_lea.vmem %s570_s1, %s578_s12 }
   0xe   : > { %s211_s22 = scalar_lea.vmem %s569_s0, %s435_s16  ;;  %v230_v1 = vld [vmem:[%s217_s19] sm:$0x1]  ;;  %s220_s25 = scalar_lea.vmem %s571_s2, %s578_s12 }
   0xf   : > { %v231_v2 = vunpack.c.0.s8 %v230_v1  ;;  %v233_v3 = vld [vmem:[%s211_s22] sm:$0x3]  ;;  %v429_v4 = vld [vmem:[%s211_s22 + $0x2] sm:$0x3]  ;;  %v430_v5 = vld [vmem:[%s211_s22 + $0x4] sm:$0x3]  ;;  %s223_s29 = scalar_lea.vmem %s572_s3, %s578_s12 }
  0x10   : > { %v236_v6 = vmax.f32 %v233_v3, %v429_v4  ;;  %v431_v8 = vld [vmem:[%s211_s22 + $0x6] sm:$0x3] }
  0x11   : > { %v232_v7 = vand.u32 255, %v231_v2 }
  0x12   : > { %v239_v9 = vmax.f32 %v236_v6, %v430_v5 }
  0x13   : > { %vm271_vm0 = vcmp.ne.s32.totalorder %v232_v7, 255  ;;  %vm247_vm2 = vcmp.eq.s32.totalorder %v232_v7, 0  ;;  %vm254_vm3 = vcmp.eq.s32.totalorder %v232_v7, 1  ;;  %vm261_vm4 = vcmp.eq.s32.totalorder %v232_v7, 2 }
  0x14   : > { %v242_v10 = vmax.f32 %v239_v9, %v431_v8  ;;  %v432_v15 = vsel %vm271_vm0, 1.0, %v499_v0  ;;  %v282_v26 = vld [vmem:[#allocation3] sm:$0x1]  ;;  %v248_v36 = vsel %vm247_vm2, %v233_v3, 0.0  ;;  %v255_v37 = vsel %vm254_vm3, %v429_v4, 0.0 }
  0x15   : > { %v284_v20 = vsel %vm283_vm1, %v432_v15, 0.0  ;;  %v256_v38 = vadd.f32 %v255_v37, %v248_v36  ;;  %v262_v39 = vsel %vm261_vm4, %v430_v5, 0.0  ;;  %vm268_vm5 = vcmp.eq.s32.totalorder %v232_v7, 3  ;;  %v278_v47 = vld [vmem:[#allocation2] sm:$0x3] }
  0x16   : > { %v243_v11 = vsub.f32 %v233_v3, %v242_v10  ;;  %v250_v12 = vsub.f32 %v429_v4, %v242_v10  ;;  %v257_v13 = vsub.f32 %v430_v5, %v242_v10  ;;  %v264_v14 = vsub.f32 %v431_v8, %v242_v10 }
  0x17   : > { %v285_v21 = vrot.slane %v284_v20, 4  ;;  %v263_v40 = vadd.f32 %v262_v39, %v256_v38  ;;  %v269_v41 = vsel %vm268_vm5, %v431_v8, 0.0 }
  0x18   : > { %v244_v16 = vmul.f32 1.442695, %v243_v11  ;;  %v251_v17 = vmul.f32 1.442695, %v250_v12  ;;  %v258_v18 = vmul.f32 1.442695, %v257_v13 }
  0x19   : > { %v265_v19 = vmul.f32 1.442695, %v264_v14  ;;  %v286_v22 = vadd.f32 %v285_v21, %v284_v20  ;;  %v270_v43 = vadd.f32 %v269_v41, %v263_v40 }
  0x1a   : > { %465 = vpow2.f32 %v244_v16 }
  0x1b   : > { %467 = vpow2.f32 %v251_v17  ;;  %v287_v23 = vrot.slane %v286_v22, 2 }
  0x1c   : > { %469 = vpow2.f32 %v258_v18 }
  0x1d   : > { %471 = vpow2.f32 %v265_v19  ;;  %v288_v24 = vadd.f32 %v287_v23, %v286_v22 }
  0x1f   : > { %v289_v25 = vrot.slane %v288_v24, 1 }
  0x21   : > { %v290_v27 = vadd.f32 %v289_v25, %v288_v24 }
  0x23   : > { %v291_v28 = vadd.f32 %v290_v27, %v282_v26 }
  0x25   : > { %292 = vst [vmem:[#allocation3] sm:$0x1] %v291_v28 }
  0x27   : > { %v466_v29 = vpop.eup %465 }
  0x28   : > { %v468_v30 = vpop.eup %467 }
  0x29   : > { %v470_v31 = vpop.eup %469  ;;  %v253_v32 = vadd.f32 %v468_v30, %v466_v29 }
  0x2a   : > { %v472_v33 = vpop.eup %471 }
  0x2b   : > { %v260_v34 = vadd.f32 %v470_v31, %v253_v32 }
  0x2c   : > { %v310_v51 = vld [vmem:[#allocation3] sm:$0x1] }
  0x2d   : > { %v267_v35 = vadd.f32 %v472_v33, %v260_v34  ;;  %v312_v53 = vsel %vm311_vm6, %v310_v51, 0.0 }
  0x2f   : > { %473 = vlog2.f32 %v267_v35 }
  0x3c   : > { %v474_v42 = vpop.eup %473 }
  0x3d   : > { %v275_v44 = vmul.f32 0.6931472, %v474_v42 }
  0x3f   : > { %v276_v45 = vadd.f32 %v275_v44, %v242_v10 }
  0x41   : > { %v277_v46 = vsub.f32 %v276_v45, %v270_v43 }
  0x43   : > { %v279_v48 = vsel %vm271_vm0, %v277_v46, 0.0 }
  0x44   : > { %v280_v49 = vadd.f32 %v279_v48, %v278_v47 }
  0x46   : > { %281 = vst [vmem:[#allocation2] sm:$0x3] %v280_v49 }
  0x4d   : > { %v296_v50 = vld [vmem:[#allocation2] sm:$0x3] }
  0x4e   : > { %v297_v52 = vsel %vm283_vm1, %v296_v50, 0.0 }
  0x4f   : > { %298 = vadd.xlane.f32.xlu0 %v297_v52 }
  0x53   : > { %313 = vadd.xlane.f32.xlu0 %v312_v53 }
  0xd8   : > { %v299_v54 = vpop.xlane.xlu0 %298 }
  0xd9   : > { %v300_v55 = vrot.slane %v299_v54, 4 }
  0xdb   : > { %v301_v56 = vadd.f32 %v300_v55, %v299_v54 }
  0xdc   : > { %v314_v57 = vpop.xlane.xlu0 %313 }
  0xdd   : > { %v302_v58 = vrot.slane %v301_v56, 2  ;;  %v315_v59 = vrot.slane %v314_v57, 4 }
  0xdf   : > { %v316_v60 = vadd.f32 %v315_v59, %v314_v57  ;;  %v303_v61 = vadd.f32 %v302_v58, %v301_v56 }
  0xe1   : > { %v317_v62 = vrot.slane %v316_v60, 2  ;;  %v304_v63 = vrot.slane %v303_v61, 1 }
  0xe3   : > { %v318_v0 = vadd.f32 %v317_v62, %v316_v60  ;;  %v305_v1 = vadd.f32 %v304_v63, %v303_v61 }
  0xe5   : > { %436 = vpush %v305_v1  ;;  %v319_v2 = vrot.slane %v318_v0, 1 }
  0xe7   : > { %v320_v3 = vadd.f32 %v319_v2, %v318_v0 }
  0xe9   : > { %438 = vpush %v320_v3 }
 0x116   : > { %s437_s26 = spop %436 }
 0x117   : > { %v307_v4 = vstv %s437_s26 }
 0x118   : > { %309 = vst.msk [vmem:[%s220_s25] sm:$0x1] %vm308_vm7, %v307_v4 }
 0x11a   : > { %s439_s30 = spop %438 }
 0x11b   : > { %v322_v5 = vstv %s439_s30 }
 0x11c   : > { %323 = vst.msk [vmem:[%s223_s29] sm:$0x1] %vm308_vm7, %v322_v5 }
 0x11d PF: > { %s14_s14 = sadd.s32 1, %s497_s14   ;;  %s573_s12 = smov %s493_s13 }
 0x11e   : > { %p11_p5 = scmp.ge.s32.totalorder %s14_s14, 4   ;;  %s574_s13 = smov %s576_s15 }
 0x120   :  { %13 = sbr.rel (!%p11_p5) target bundleno = 2 (0x2), region = 84 }

</bundles_post_ra>
